<compile_context>
chip_gen: v5e
topology: v5e:2x2
jax: 0.10.0
libtpu: 0.0.40
codegen_flags: <defaults>
</compile_context>

<pallas_src>
import jax
import jax.numpy as jnp
from jax import lax
from jax.experimental import pallas as pl
from jax.experimental.pallas import tpu as pltpu


# ---------------------------------------------------------------------------
# Fused kernel
# ---------------------------------------------------------------------------
def _path_init_kernel(slot_ref, tpad_ref, o_ref):
    """Builds one lane-dense row block of the path embedding.

    slot_ref : (TR, n)        int32  slot ids: 0=not_conn, 1=self_loop, e+2=edge e
    tpad_ref : (g, S, g*d)    f32    lane-padded gather table; slab j holds the
                                     (S, d) table at lane offset j*d, zeros elsewhere
    o_ref    : (TR, n*d)      f32    lane-dense output row block
    """
    tr, n = slot_ref.shape
    g, num_slots, gd = tpad_ref.shape
    d_model = gd // g

    slot = slot_ref[...]                                           # (TR, n) int32
    sid = lax.broadcasted_iota(jnp.int32, (tr, num_slots), 1)      # hoisted

    def gather_group(c, width):
        # (TR, g*d) built as a sum of one-hot gathers; the j-th dot's RHS is
        # already placed at lane offset j*d, so the MXU does the placement and
        # the store below is a full, 128-lane-aligned vst.
        acc = None
        for j in range(width):
            t = c * g + j
            onehot = (slot[:, t:t + 1] == sid).astype(jnp.float32)       # (TR, S)
            part = jnp.dot(onehot, tpad_ref[j],
                           preferred_element_type=jnp.float32)           # (TR, g*d)
            acc = part if acc is None else acc + part
        return acc

    n_full = n // g
    for c in range(n_full):                    # static unroll; n is small here
        o_ref[:, c * gd:(c + 1) * gd] = gather_group(c, g)

    rem = n - n_full * g
    if rem:                                    # tail group (< 128 lanes wide)
        acc = gather_group(n_full, rem)
        o_ref[:, n_full * gd:n_full * gd + rem * d_model] = acc[:, :rem * d_model]


# ---------------------------------------------------------------------------
# Block-size / VMEM budgeting
# ---------------------------------------------------------------------------
def _round_up(x, m):
    return ((x + m - 1) // m) * m


def _vmem_budget_bytes():
    """Scoped-VMEM limit ~ half of physical VMEM, capped at 64 MiB:
    64 MiB on v5e/v6e (128 MiB physical), 32 MiB on v7x (64 MiB physical)."""
    try:
        phys = int(pltpu.get_tpu_info().vmem_capacity_bytes)
    except Exception:          # defensive fallback: assume v7x-sized VMEM
        phys = 64 << 20
    if phys <= 0:
        phys = 64 << 20
    return int(min(max(phys // 2, 16 << 20), 64 << 20))


def _pick_block_rows(rows, n, d_model, num_slots, block_bytes_cap):
    lanes = n * d_model
    # f32/int32 bytes tied to one block row: double-buffered output tile, the
    # (TR, S) one-hot temporary, and the double-buffered int32 slot row.
    bytes_per_row = 4 * (2 * lanes + num_slots + 2 * n)
    cap = max(8, (block_bytes_cap // max(1, bytes_per_row)) // 8 * 8)
    # Keep the grid at ~4 steps (>= 2 so both v7x TensorCores get work) when
    # the row count allows; one (8, lanes) tile is the floor.
    target = max(8, _round_up((rows + 3) // 4, 8))
    tr = min(cap, target, _round_up(rows, 8))
    return max(8, tr)


# ---------------------------------------------------------------------------
# Wrapper
# ---------------------------------------------------------------------------
def path_init_forward(params, batch, batch_size, num_nodes, edge_index, edge_attr):
    b, n = batch_size, num_nodes
    d_model = params["self_loop_token"].shape[0]
    num_edges = edge_attr.shape[0]

    # ---- edge encoder + gather table (tiny one-off XLA work) --------------
    emb = edge_attr.astype(jnp.float32) @ params["edge_w"] + params["edge_b"]
    table = jnp.concatenate(
        [params["not_conn_token"][None, :],          # slot 0
         params["self_loop_token"][None, :],         # slot 1
         emb], axis=0).astype(jnp.float32)           # slot e+2   -> (S, d)
    num_slots = num_edges + 2

    # ---- slot map (int32), same write order as the PyTorch module ---------
    # 0 = not connected, 1 = self loop, e+2 = edge e.  Edge ids first,
    # diagonal second == PyTorch write order (diag overrides edge writes).
    eb = batch[edge_index[0]].astype(jnp.int32)
    src = (edge_index[0] % n).astype(jnp.int32)
    tgt = (edge_index[1] % n).astype(jnp.int32)
    rows = eb * n + src
    slot = jnp.zeros((b * n, n), jnp.int32)
    if num_edges > 0:
        slot = slot.at[rows, tgt].set(jnp.arange(num_edges, dtype=jnp.int32) + 2)
    col_ids = jnp.arange(n, dtype=jnp.int32)[None, :]
    src_of_row = (jnp.arange(b * n, dtype=jnp.int32) % n)[:, None]
    slot = jnp.where(col_ids == src_of_row, 1, slot)

    # ---- lane-padded gather table: g targets per 128-lane output chunk ----
    g = max(1, 128 // d_model)
    g = min(g, n)
    gd = g * d_model
    tpad = jnp.zeros((g, num_slots, gd), jnp.float32)
    for j in range(g):
        tpad = tpad.at[j, :, j * d_model:(j + 1) * d_model].set(table)

    # ---- single fused Pallas kernel ----------------------------------------
    lanes = n * d_model
    vmem_limit = _vmem_budget_bytes()
    tr = _pick_block_rows(b * n, n, d_model, num_slots, vmem_limit // 8)
    grid = (pl.cdiv(b * n, tr),)

    out = pl.pallas_call(
        _path_init_kernel,
        grid=grid,
        in_specs=[
            pl.BlockSpec((tr, n), lambda i: (i, 0)),                 # slot map
            pl.BlockSpec((g, num_slots, gd), lambda i: (0, 0, 0)),   # gather table
        ],
        out_specs=pl.BlockSpec((tr, lanes), lambda i: (i, 0)),
        out_shape=jax.ShapeDtypeStruct((b * n, lanes), jnp.float32),
        compiler_params=pltpu.CompilerParams(
            dimension_semantics=("parallel",),
            vmem_limit_bytes=vmem_limit),
    )(slot, tpad)

    # Free reshape: (b*n, n*d_model) has the same memory order as (b,n,n,d).
    return out.reshape(b, n, n, d_model)


# ---------------------------------------------------------------------------
# Pure-JAX reference (mirrors the PyTorch forward exactly)
# ---------------------------------------------------------------------------
def path_init_reference(params, batch, b, n, edge_index, edge_attr):
    d_model = params["self_loop_token"].shape[0]
    path = jnp.ones((b, n, n, d_model), jnp.float32) * params["not_conn_token"]
    edge_emb = edge_attr @ params["edge_w"] + params["edge_b"]
    eb = batch[edge_index[0]]
    s = edge_index[0] % n
    t = edge_index[1] % n
    path = path.at[eb, s, t].set(edge_emb)
    di = jnp.arange(n)
    path = path.at[:, di, di].set(params["self_loop_token"])
    return path


# ---------------------------------------------------------------------------
if __name__ == "__main__":
    key = jax.random.PRNGKey(0)
    k1, k2, k3, k4, k5 = jax.random.split(key, 5)

    b, n = 2, 8            # batch_size, num_nodes per graph
    d_edge, d_model = 8, 32
    num_edges = 12

    params = {
        "self_loop_token": jax.random.normal(k1, (d_model,), jnp.float32),
        "not_conn_token": jax.random.normal(k2, (d_model,), jnp.float32),
        "edge_w": jax.random.normal(k3, (d_edge, d_model), jnp.float32) * 0.1,
        "edge_b": jax.random.normal(k4, (d_model,), jnp.float32) * 0.1,
    }

    # node -> graph assignment, edge index (global node ids; includes a
    # self-loop so the diag-after-edges ordering is exercised), edge attrs
    batch = jnp.repeat(jnp.arange(b, dtype=jnp.int32), n)         # (b*n,)
    sources = jnp.array([0, 1, 2, 3, 5, 5, 8, 9, 10, 12, 14, 15], jnp.int32)
    targets = jnp.array([3, 4, 6, 7, 5, 0, 11, 12, 13, 15, 8, 9], jnp.int32)
    edge_index = jnp.stack([sources, targets])                    # (2, E)
    edge_attr = jax.random.normal(k5, (num_edges, d_edge), jnp.float32)

    out = path_init_forward(params, batch, b, n, edge_index, edge_attr)
    out = jax.block_until_ready(out)

    ref = path_init_reference(params, batch, b, n, edge_index, edge_attr)
    assert out.shape == (b, n, n, d_model)
    assert jnp.allclose(out, ref, atol=1e-5, rtol=1e-5), "mismatch vs reference"

    print("KERNEL_OK")
</pallas_src>

<mosaic_0001>
module attributes {stable_mosaic.version = 11 : i64} {
  func.func @_path_init_kernel(%arg0: i32, %arg1: memref<8x8xi32, #tpu.memory_space<vmem>>, %arg2: memref<4x14x128xf32, #tpu.memory_space<vmem>>, %arg3: memref<8x256xf32, #tpu.memory_space<vmem>>) attributes {dimension_semantics = [#tpu.dimension_semantics<parallel>], iteration_bounds = array<i64: 2>, scalar_prefetch = 0 : i64, scratch_operands = 0 : i64, tpu.core_type = #tpu.core_type<tc>, window_params = [{transform_indices = @transform_0, window_bounds = array<i64: 8, 8>}, {pipeline_mode = #tpu.pipeline_mode<synchronous>, transform_indices = @transform_1, window_bounds = array<i64: 4, 14, 128>}, {transform_indices = @transform_2, window_bounds = array<i64: 8, 256>}]} {
    %c0 = arith.constant 0 : index
    %c0_0 = arith.constant 0 : index
    %0 = vector.load %arg1[%c0, %c0_0] : memref<8x8xi32, #tpu.memory_space<vmem>>, vector<8x8xi32>
    %1 = tpu.iota {dimensions = array<i32: 1>} : vector<8x14xi32>
    %2 = vector.extract_strided_slice %0 {offsets = [0, 0], sizes = [8, 1], strides = [1, 1]} : vector<8x8xi32> to vector<8x1xi32>
    %3 = vector.broadcast %2 : vector<8x1xi32> to vector<8x14xi32>
    %4 = arith.cmpi eq, %3, %1 : vector<8x14xi32>
    %5 = arith.extui %4 : vector<8x14xi1> to vector<8x14xi32>
    %6 = arith.sitofp %5 : vector<8x14xi32> to vector<8x14xf32>
    %c0_1 = arith.constant 0 : index
    %c0_2 = arith.constant 0 : index
    %c0_3 = arith.constant 0 : index
    %7 = vector.load %arg2[%c0_1, %c0_2, %c0_3] : memref<4x14x128xf32, #tpu.memory_space<vmem>>, vector<1x14x128xf32>
    %8 = vector.shape_cast %7 : vector<1x14x128xf32> to vector<14x128xf32>
    %cst = arith.constant dense<0.000000e+00> : vector<8x128xf32>
    %9 = tpu.matmul %6, %8, %cst {dimension_numbers = #tpu.dot_dimension_numbers<[1], [0], [0], [1], [0, 0, 1, 1], [], []>} : vector<8x14xf32>, vector<14x128xf32>, vector<8x128xf32> -> vector<8x128xf32>
    %10 = vector.extract_strided_slice %0 {offsets = [0, 1], sizes = [8, 1], strides = [1, 1]} : vector<8x8xi32> to vector<8x1xi32>
    %11 = vector.broadcast %10 : vector<8x1xi32> to vector<8x14xi32>
    %12 = arith.cmpi eq, %11, %1 : vector<8x14xi32>
    %13 = arith.extui %12 : vector<8x14xi1> to vector<8x14xi32>
    %14 = arith.sitofp %13 : vector<8x14xi32> to vector<8x14xf32>
    %c1 = arith.constant 1 : index
    %c0_4 = arith.constant 0 : index
    %c0_5 = arith.constant 0 : index
    %15 = vector.load %arg2[%c1, %c0_4, %c0_5] : memref<4x14x128xf32, #tpu.memory_space<vmem>>, vector<1x14x128xf32>
    %16 = vector.shape_cast %15 : vector<1x14x128xf32> to vector<14x128xf32>
    %cst_6 = arith.constant dense<0.000000e+00> : vector<8x128xf32>
    %17 = tpu.matmul %14, %16, %cst_6 {dimension_numbers = #tpu.dot_dimension_numbers<[1], [0], [0], [1], [0, 0, 1, 1], [], []>} : vector<8x14xf32>, vector<14x128xf32>, vector<8x128xf32> -> vector<8x128xf32>
    %18 = arith.addf %9, %17 : vector<8x128xf32>
    %19 = vector.extract_strided_slice %0 {offsets = [0, 2], sizes = [8, 1], strides = [1, 1]} : vector<8x8xi32> to vector<8x1xi32>
    %20 = vector.broadcast %19 : vector<8x1xi32> to vector<8x14xi32>
    %21 = arith.cmpi eq, %20, %1 : vector<8x14xi32>
    %22 = arith.extui %21 : vector<8x14xi1> to vector<8x14xi32>
    %23 = arith.sitofp %22 : vector<8x14xi32> to vector<8x14xf32>
    %c2 = arith.constant 2 : index
    %c0_7 = arith.constant 0 : index
    %c0_8 = arith.constant 0 : index
    %24 = vector.load %arg2[%c2, %c0_7, %c0_8] : memref<4x14x128xf32, #tpu.memory_space<vmem>>, vector<1x14x128xf32>
    %25 = vector.shape_cast %24 : vector<1x14x128xf32> to vector<14x128xf32>
    %cst_9 = arith.constant dense<0.000000e+00> : vector<8x128xf32>
    %26 = tpu.matmul %23, %25, %cst_9 {dimension_numbers = #tpu.dot_dimension_numbers<[1], [0], [0], [1], [0, 0, 1, 1], [], []>} : vector<8x14xf32>, vector<14x128xf32>, vector<8x128xf32> -> vector<8x128xf32>
    %27 = arith.addf %18, %26 : vector<8x128xf32>
    %28 = vector.extract_strided_slice %0 {offsets = [0, 3], sizes = [8, 1], strides = [1, 1]} : vector<8x8xi32> to vector<8x1xi32>
    %29 = vector.broadcast %28 : vector<8x1xi32> to vector<8x14xi32>
    %30 = arith.cmpi eq, %29, %1 : vector<8x14xi32>
    %31 = arith.extui %30 : vector<8x14xi1> to vector<8x14xi32>
    %32 = arith.sitofp %31 : vector<8x14xi32> to vector<8x14xf32>
    %c3 = arith.constant 3 : index
    %c0_10 = arith.constant 0 : index
    %c0_11 = arith.constant 0 : index
    %33 = vector.load %arg2[%c3, %c0_10, %c0_11] : memref<4x14x128xf32, #tpu.memory_space<vmem>>, vector<1x14x128xf32>
    %34 = vector.shape_cast %33 : vector<1x14x128xf32> to vector<14x128xf32>
    %cst_12 = arith.constant dense<0.000000e+00> : vector<8x128xf32>
    %35 = tpu.matmul %32, %34, %cst_12 {dimension_numbers = #tpu.dot_dimension_numbers<[1], [0], [0], [1], [0, 0, 1, 1], [], []>} : vector<8x14xf32>, vector<14x128xf32>, vector<8x128xf32> -> vector<8x128xf32>
    %36 = arith.addf %27, %35 : vector<8x128xf32>
    %c0_13 = arith.constant 0 : index
    %c0_14 = arith.constant 0 : index
    %37 = vector.load %arg3[%c0_13, %c0_14] : memref<8x256xf32, #tpu.memory_space<vmem>>, vector<8x128xf32>
    tpu.vector_store %arg3[%c0_13, %c0_14], %36 {strides = array<i32>} : memref<8x256xf32, #tpu.memory_space<vmem>>, vector<8x128xf32>,
    %38 = vector.extract_strided_slice %0 {offsets = [0, 4], sizes = [8, 1], strides = [1, 1]} : vector<8x8xi32> to vector<8x1xi32>
    %39 = vector.broadcast %38 : vector<8x1xi32> to vector<8x14xi32>
    %40 = arith.cmpi eq, %39, %1 : vector<8x14xi32>
    %41 = arith.extui %40 : vector<8x14xi1> to vector<8x14xi32>
    %42 = arith.sitofp %41 : vector<8x14xi32> to vector<8x14xf32>
    %c0_15 = arith.constant 0 : index
    %c0_16 = arith.constant 0 : index
    %c0_17 = arith.constant 0 : index
    %43 = vector.load %arg2[%c0_15, %c0_16, %c0_17] : memref<4x14x128xf32, #tpu.memory_space<vmem>>, vector<1x14x128xf32>
    %44 = vector.shape_cast %43 : vector<1x14x128xf32> to vector<14x128xf32>
    %cst_18 = arith.constant dense<0.000000e+00> : vector<8x128xf32>
    %45 = tpu.matmul %42, %44, %cst_18 {dimension_numbers = #tpu.dot_dimension_numbers<[1], [0], [0], [1], [0, 0, 1, 1], [], []>} : vector<8x14xf32>, vector<14x128xf32>, vector<8x128xf32> -> vector<8x128xf32>
    %46 = vector.extract_strided_slice %0 {offsets = [0, 5], sizes = [8, 1], strides = [1, 1]} : vector<8x8xi32> to vector<8x1xi32>
    %47 = vector.broadcast %46 : vector<8x1xi32> to vector<8x14xi32>
    %48 = arith.cmpi eq, %47, %1 : vector<8x14xi32>
    %49 = arith.extui %48 : vector<8x14xi1> to vector<8x14xi32>
    %50 = arith.sitofp %49 : vector<8x14xi32> to vector<8x14xf32>
    %c1_19 = arith.constant 1 : index
    %c0_20 = arith.constant 0 : index
    %c0_21 = arith.constant 0 : index
    %51 = vector.load %arg2[%c1_19, %c0_20, %c0_21] : memref<4x14x128xf32, #tpu.memory_space<vmem>>, vector<1x14x128xf32>
    %52 = vector.shape_cast %51 : vector<1x14x128xf32> to vector<14x128xf32>
    %cst_22 = arith.constant dense<0.000000e+00> : vector<8x128xf32>
    %53 = tpu.matmul %50, %52, %cst_22 {dimension_numbers = #tpu.dot_dimension_numbers<[1], [0], [0], [1], [0, 0, 1, 1], [], []>} : vector<8x14xf32>, vector<14x128xf32>, vector<8x128xf32> -> vector<8x128xf32>
    %54 = arith.addf %45, %53 : vector<8x128xf32>
    %55 = vector.extract_strided_slice %0 {offsets = [0, 6], sizes = [8, 1], strides = [1, 1]} : vector<8x8xi32> to vector<8x1xi32>
    %56 = vector.broadcast %55 : vector<8x1xi32> to vector<8x14xi32>
    %57 = arith.cmpi eq, %56, %1 : vector<8x14xi32>
    %58 = arith.extui %57 : vector<8x14xi1> to vector<8x14xi32>
    %59 = arith.sitofp %58 : vector<8x14xi32> to vector<8x14xf32>
    %c2_23 = arith.constant 2 : index
    %c0_24 = arith.constant 0 : index
    %c0_25 = arith.constant 0 : index
    %60 = vector.load %arg2[%c2_23, %c0_24, %c0_25] : memref<4x14x128xf32, #tpu.memory_space<vmem>>, vector<1x14x128xf32>
    %61 = vector.shape_cast %60 : vector<1x14x128xf32> to vector<14x128xf32>
    %cst_26 = arith.constant dense<0.000000e+00> : vector<8x128xf32>
    %62 = tpu.matmul %59, %61, %cst_26 {dimension_numbers = #tpu.dot_dimension_numbers<[1], [0], [0], [1], [0, 0, 1, 1], [], []>} : vector<8x14xf32>, vector<14x128xf32>, vector<8x128xf32> -> vector<8x128xf32>
    %63 = arith.addf %54, %62 : vector<8x128xf32>
    %64 = vector.extract_strided_slice %0 {offsets = [0, 7], sizes = [8, 1], strides = [1, 1]} : vector<8x8xi32> to vector<8x1xi32>
    %65 = vector.broadcast %64 : vector<8x1xi32> to vector<8x14xi32>
    %66 = arith.cmpi eq, %65, %1 : vector<8x14xi32>
    %67 = arith.extui %66 : vector<8x14xi1> to vector<8x14xi32>
    %68 = arith.sitofp %67 : vector<8x14xi32> to vector<8x14xf32>
    %c3_27 = arith.constant 3 : index
    %c0_28 = arith.constant 0 : index
    %c0_29 = arith.constant 0 : index
    %69 = vector.load %arg2[%c3_27, %c0_28, %c0_29] : memref<4x14x128xf32, #tpu.memory_space<vmem>>, vector<1x14x128xf32>
    %70 = vector.shape_cast %69 : vector<1x14x128xf32> to vector<14x128xf32>
    %cst_30 = arith.constant dense<0.000000e+00> : vector<8x128xf32>
    %71 = tpu.matmul %68, %70, %cst_30 {dimension_numbers = #tpu.dot_dimension_numbers<[1], [0], [0], [1], [0, 0, 1, 1], [], []>} : vector<8x14xf32>, vector<14x128xf32>, vector<8x128xf32> -> vector<8x128xf32>
    %72 = arith.addf %63, %71 : vector<8x128xf32>
    %c0_31 = arith.constant 0 : index
    %c128 = arith.constant 128 : index
    %73 = vector.load %arg3[%c0_31, %c128] : memref<8x256xf32, #tpu.memory_space<vmem>>, vector<8x128xf32>
    tpu.vector_store %arg3[%c0_31, %c128], %72 {strides = array<i32>} : memref<8x256xf32, #tpu.memory_space<vmem>>, vector<8x128xf32>,
    return
  }
  func.func @transform_0(%arg0: i32) -> (i32, i32) {
    %c0_i32 = arith.constant 0 : i32
    %c0_i32_0 = arith.constant 0 : i32
    return %arg0, %c0_i32 : i32, i32
  }
  func.func @transform_1(%arg0: i32) -> (i32, i32, i32) {
    %c0_i32 = arith.constant 0 : i32
    %c0_i32_0 = arith.constant 0 : i32
    %c0_i32_1 = arith.constant 0 : i32
    %c0_i32_2 = arith.constant 0 : i32
    return %c0_i32, %c0_i32_0, %c0_i32_1 : i32, i32, i32
  }
  func.func @transform_2(%arg0: i32) -> (i32, i32) {
    %c0_i32 = arith.constant 0 : i32
    %c0_i32_0 = arith.constant 0 : i32
    return %arg0, %c0_i32 : i32, i32
  }
}

</mosaic_0001>

<bundles_post_ra>
// kernel: tpu_custom_call.1
= control target key start
LH: loop header
LB: loop body
LE: loop exit
PB: predicated region body
PF: predicated region fallthrough
CT: control target
= control target key end

     0   :  { %7 = vsyncpa [#allocation3], 0  ;;  %s831_s0 = inlined_call_operand.vmem [shape: s32[16,8], index: 0, kind: input, shape index: {}]   ;;  %s832_s1 = inlined_call_operand.vmem [shape: f32[4,14,128], index: 1, kind: input, shape index: {}]   ;;  %s833_s2 = inlined_call_operand.hbm [shape: f32[16,256], index: 2, kind: output, shape index: {}]  }
   0x1   :  { %9 = vsyncpa [#allocation3 + $0x1], 0  ;;  %s694_s9 = smov 0   ;;  %s696_s10 = smov 0  }
   0x2   :  { %s698_s11 = smov 0   ;;  %s700_s12 = smov 0  }
   0x3 LB: > { %s715_s13 = sadd.s32 4294967295, %s668_s12   ;;  %s501_s14 = sadd.s32 4294967294, %s668_s12   ;;  %s668_s12 = sphi %s700_s12, %s839_s12   ;;  %s664_s11 = sphi %s698_s11, %s838_s11   ;;  %s660_s10 = sphi %s696_s10, %s837_s10   ;;  %s656_s9 = sphi %s694_s9, %s836_s9  }
   0x4   : > { %s719_s15 = sadd.s32 1, %s668_s12   ;;  %s69_s16 = sadd.s32 1, %s664_s11 }
   0x5   : > { %s66_s17 = ssub.s32 %s668_s12, %s719_s15  ;;  %p79_p0 = scmp.ne.s32.totalorder %s664_s11, %s660_s10 }
   0x6   : > { %p67_p1 = scmp.eq.s32.totalorder %s66_s17, 0  ;;  %p80_p2 = scmp.eq.s32.totalorder %s715_s13, 1 }
   0x7   : > { %p85_p3 = scmp.ne.s32.totalorder %s660_s10, %s656_s9  ;;  %p86_p4 = scmp.eq.s32.totalorder %s501_s14, 1 }
   0x8   : > { %s730_s18 = scalar_select %p67_p1, %s664_s11, %s69_s16  }
   0x9   : > { %p732_p5 = por %p80_p2, %p79_p0  ;;  %p736_p6 = por %p86_p4, %p85_p3 }
   0xa   : > { %p504_p7 = scmp.ge.s32.totalorder %s668_s12, 1  ;;  %p114_p8 = scmp.lt.s32.totalorder %s668_s12, 3 }
   0xc   : > { %p115_p9 = pnand %p504_p7, %p114_p8 }
   0xd   : > { %p135_p10 = scmp.lt.s32.totalorder (!%p115_p9), %s715_s13, 1  ;;  %s132_s3 = sand.u32 (!%p115_p9), 1, %s660_s10  }
   0xe   : > { %118 = sbr.rel (%p115_p9) target bundleno = 295 (0x127), region = 28  ;;  %s505_s4 = sshll.u32 (!%p115_p9), %s132_s3, 4 }
   0xf   : > { %s548_s5 = sshll.u32 (!%p115_p9), %s715_s13, 4  ;;  %s134_s6 = scalar_lea.vmem (!%p115_p9), [#allocation2], %s505_s4 }
  0x10   : > { %s437_s14 = scalar_lea.hbm (!%p115_p9), %s833_s2, %s548_s5  ;;  %s439_s16 = sshll.u32 (!%p115_p9), %s134_s6, 4  ;;  %s440_s16 = int_to_ptr.vmem [resolvable:$true] %s439_s16 }
  0x11   : > { %s441_s17 = sshll.u32 (!%p115_p9), %s437_s14, 4  ;;  %s626_s25 = scalar_lea.hbm (!%p115_p9), %s833_s2, 32  ;;  %s442_s17 = int_to_ptr.hbm [resolvable:$true] %s441_s17 }
  0x12   : > { %s620_s21 = sshra.s32 (!%p115_p9), %s442_s17, 4  ;;  %s621_s21 = int_to_ptr.hbm [resolvable:$true] %s620_s21 }
  0x13   : > { %v670_v0 = vmov 2   ;;  %v671_v1 = vmov 0   ;;  %v517_v2 = vld [vmem:[%s832_s1 + $0x28] sm:$0x3f]  ;;  %s136_s23 = scalar_select %p135_p10, %s715_s13, 1  ;;  %v672_v3 = vmov 6   ;;  %v140_v22 = vlaneseq }
  0x14   : > { %597 = vset.pattern.permute.xlu0 %v670_v0  ;;  %599 = vset.pattern.permute.xlu1 %v671_v1  ;;  %vm163_vm0 = vcmask 1045504   ;;  %v673_v5 = vmov 1   ;;  %v674_v6 = vmov 3   ;;  %v675_v7 = vmov 7   ;;  %v149_v10 = vld [vmem:[%s832_s1 + $0x8] sm:$0x3f]  ;;  %p627_p0 = scmp.lt.s32.totalorder %s621_s21, %s833_s2 }
  0x15   : > { %601 = vset.pattern.permute.xlu2 %v672_v3  ;;  %518 = vmatpush.msk.msra.mxu2 %vm163_vm0, %v517_v2  ;;  %s506_s24 = sshll.u32 %s136_s23, 3  ;;  %v676_v8 = vmov 4   ;;  %v677_v9 = vmov 5   ;;  %v516_v11 = vld [vmem:[%s832_s1 + $0x20] sm:$0xff]  ;;  %v535_v13 = vld [vmem:[%s832_s1 + $0x28] sm:$0x3f] }
  0x16   : > { %s138_s27 = scalar_lea.vmem %s831_s0, %s506_s24  ;;  %513 = vmatpush.msk.msra.mxu1 %vm163_vm0, %v149_v10  ;;  %v148_v12 = vld [vmem:[%s832_s1] sm:$0xff]  ;;  %v510_v14 = vld [vmem:[%s832_s1 + $0x18] sm:$0x3f]  ;;  %v509_v16 = vld [vmem:[%s832_s1 + $0x10] sm:$0xff]  ;;  %v141_v23 = vand.u32 127, %v140_v22  ;;  %vm159_vm1 = vcmask 113664  }
  0x17   : > { %v139_v4 = vld [vmem:[%s138_s27] sm:$0xff]  ;;  %243 = vmatpush.msra.mxu2 %v516_v11  ;;  %v522_v15 = vld [vmem:[%s832_s1 + $0x38] sm:$0x3f]  ;;  %511 = vmatpush.msk.msra.mxu0 %vm163_vm0, %v510_v14  ;;  %v521_v17 = vld [vmem:[%s832_s1 + $0x30] sm:$0xff]  ;;  %v678_v27 = vmov 0.0   ;;  %s426_s13 = scalar_lea.sflag [#allocation3], %s132_s3 }
  0x18   : > { %143 = vperm.xlu1 %599, %v139_v4   ;;  %214 = vperm.xlu0 %597, %v139_v4   ;;  %v540_v18 = vld [vmem:[%s832_s1 + $0x38] sm:$0x3f]  ;;  %v293_v20 = vld [vmem:[%s832_s1 + $0x8] sm:$0x3f]  ;;  %s622_s22 = scalar_lea.hbm %s621_s21, 16 }
  0x19   : > { %355 = vperm.xlu2 %601, %v139_v4   ;;  %208 = vmatpush.msra.mxu1 %v148_v12  ;;  %v528_v19 = vld [vmem:[%s832_s1 + $0x18] sm:$0x3f]  ;;  %p623_p11 = scmp.ne.s32.totalorder %s621_s21, %s622_s22  ;;  %p628_p1 = scmp.lt.s32.totalorder %s626_s25, %s622_s22 }
  0x1a   : > { %536 = vmatpush.msk.msrb.mxu2 %vm163_vm0, %v535_v13  ;;  %523 = vmatpush.msk.msra.mxu3 %vm163_vm0, %v522_v15 }
  0x1b   : > { %182 = vmatpush.msra.mxu0 %v509_v16  ;;  %531 = vmatpush.msk.msrb.mxu1 %vm163_vm0, %v293_v20  ;;  %p624_p12 = pnand %p623_p11, %p732_p5  ;;  %p629_p2 = por %p628_p1, %p627_p0 }
  0x1c   : > { %383 = vmatpush.msrb.mxu2 %v516_v11  ;;  %279 = vmatpush.msra.mxu3 %v521_v17 }
  0x1d   : > { %529 = vmatpush.msk.msrb.mxu0 %vm163_vm0, %v528_v19  ;;  %349 = vmatpush.msrb.mxu1 %v148_v12  ;;  %p625_p13 = pneg %p624_p12 }
  0x1e   : > { %541 = vmatpush.msk.msrb.mxu3 %vm163_vm0, %v540_v18 }
  0x1f   : > { %323 = vmatpush.msrb.mxu0 %v509_v16  ;;  %p630_p3 = pnand %p629_p2, %p625_p13 }
  0x20   : > { %600 = vset.pattern.permute.xlu1 %v673_v5  ;;  %598 = vset.pattern.permute.xlu0 %v674_v6 }
  0x21   : > { %151 = vperm.xlu1 %600, %v139_v4   ;;  %250 = vperm.xlu0 %598, %v139_v4  }
  0x22   : > { %602 = vset.pattern.permute.xlu2 %v675_v7  ;;  %418 = vmatpush.msrb.mxu3 %v521_v17 }
  0x23   : > { %390 = vperm.xlu2 %602, %v139_v4  }
  0x29   : > { %603 = vset.pattern.permute.xlu1 %v676_v8  ;;  %605 = vset.pattern.permute.xlu0 %v675_v7 }
  0x2a   : > { %287 = vperm.xlu1 %603, %v139_v4  }
  0x2b   : > { %604 = vset.pattern.permute.xlu2 %v677_v9 }
  0x2c   : > { %295 = vperm.xlu2 %604, %v139_v4  }
  0x73   : > { %v356_v21 = vpop.permute.xlu2 %355 }
  0x74   : > { %vm357_vm4 = vcmp.eq.s32.totalorder %v356_v21, %v141_v23 }
  0x75   : > { %v533_v32 = vsel %vm357_vm4, 1.0, %v678_v27 }
  0x7d   : > { %v391_v26 = vpop.permute.xlu2 %390 }
  0x7e   : > { %vm392_vm8 = vcmp.eq.s32.totalorder %v391_v26, %v141_v23 }
  0x7f   : > { %v538_v38 = vsel %vm392_vm8, 1.0, %v678_v27 }
  0x86   : > { %v296_v35 = vpop.permute.xlu2 %295 }
  0x87   : > { %vm297_vm7 = vcmp.eq.s32.totalorder %v296_v35, %v141_v23 }
  0x88   : > { %v526_v36 = vsel %vm297_vm7, 1.0, %v678_v27 }
  0x8a   : > { %v215_v24 = vpop.permute.xlu0 %214  ;;  %v144_v25 = vpop.permute.xlu1 %143 }
  0x8b   : > { %vm216_vm2 = vcmp.eq.s32.totalorder %v215_v24, %v141_v23  ;;  %vm145_vm3 = vcmp.eq.s32.totalorder %v144_v25, %v141_v23 }
  0x8c   : > { %v515_v28 = vsel %vm216_vm2, 1.0, %v678_v27  ;;  %v507_v29 = vsel %vm145_vm3, 1.0, %v678_v27 }
  0x8d   : > { %519 = vmatmul.msk.f32.vlgmr.msra.gmra.mxu2 %vm159_vm1, %v515_v28  ;;  %514 = vmatmul.msk.f32.vlgmr.msra.gmra.mxu1 %vm159_vm1, %v507_v29 }
  0x93   : > { %v152_v30 = vpop.permute.xlu1 %151  ;;  %v251_v31 = vpop.permute.xlu0 %250 }
  0x94   : > { %vm153_vm5 = vcmp.eq.s32.totalorder %v152_v30, %v141_v23  ;;  %vm252_vm6 = vcmp.eq.s32.totalorder %v251_v31, %v141_v23 }
  0x95   : > { %v508_v33 = vsel %vm153_vm5, 1.0, %v678_v27  ;;  %v520_v34 = vsel %vm252_vm6, 1.0, %v678_v27  ;;  %537 = vmatmul.msk.f32.vlgmr.msrb.gmra.mxu2 %vm159_vm1, %v533_v32 }
  0x96   : > { %512 = vmatmul.msk.f32.vlgmr.msra.gmra.mxu0 %vm159_vm1, %v508_v33  ;;  %524 = vmatmul.msk.f32.vlgmr.msra.gmra.mxu3 %vm159_vm1, %v520_v34 }
  0x9c   : > { %v288_v37 = vpop.permute.xlu1 %287 }
  0x9d   : > { %vm289_vm9 = vcmp.eq.s32.totalorder %v288_v37, %v141_v23 }
  0x9e   : > { %v525_v39 = vsel %vm289_vm9, 1.0, %v678_v27  ;;  %542 = vmatmul.msk.f32.vlgmr.msrb.gmra.mxu3 %vm159_vm1, %v538_v38  ;;  %530 = vmatmul.msk.f32.vlgmr.msrb.gmra.mxu0 %vm159_vm1, %v526_v36 }
  0x9f   : > { %532 = vmatmul.msk.f32.vlgmr.msrb.gmra.mxu1 %vm159_vm1, %v525_v39 }
 0x10a   : > { %v210_v40 = vpop.f32.mrf.mxu1 }
 0x110   : > { %v245_v42 = vpop.f32.mrf.mxu2 }
 0x113   : > { %v184_v41 = vpop.f32.mrf.mxu0 }
 0x114   : > { %v211_v43 = vadd.f32 %v210_v40, %v184_v41 }
 0x116   : > { %v248_v44 = vadd.f32 %v245_v42, %v211_v43 }
 0x118   : > { %v385_v50 = vpop.f32.mrf.mxu2 }
 0x119   : > { %v281_v45 = vpop.f32.mrf.mxu3 }
 0x11a   : > { %v284_v46 = vadd.f32 %v281_v45, %v248_v44 }
 0x11b   : > { %v325_v47 = vpop.f32.mrf.mxu0 }
 0x11c   : > { %285 = vst [vmem:[%s134_s6] sm:$0xff] %v284_v46  ;;  %v351_v48 = vpop.f32.mrf.mxu1 }
 0x11d   : > { %v352_v49 = vadd.f32 %v351_v48, %v325_v47 }
 0x11f   : > { %v388_v51 = vadd.f32 %v385_v50, %v352_v49 }
 0x121   : > { %v420_v52 = vpop.f32.mrf.mxu3 }
 0x122   : > { %v423_v53 = vadd.f32 %v420_v52, %v388_v51 }
 0x124   : > { %424 = vst [vmem:[%s134_s6 + $0x8] sm:$0xff] %v423_v53 }
 0x125   : > { %633 = shalt.err (!%p630_p3)
}
 0x126   : > { %549 = dma.vmem_to_hbm [thread:$0]  (%p732_p5), %s440_s16, 256, %s442_s17, %s426_s13  }
 0x127 PF: > { %p555_p4 = scmp.ge.s32.totalorder %s668_s12, 2  ;;  %s453_s28 = sand.u32 1, %s656_s9  }
 0x128   : > { %s454_s29 = scalar_lea.sflag [#allocation3], %s453_s28 }
 0x129   : > { %p552_p7 = pnand %p555_p4, %p736_p6 }
 0x12b   : > { %p553_p8 = pneg %p552_p7 }
 0x12d   : > { %651 = dma.done.wait (%p553_p8), %s454_s29, 256  }
 0x12e   : > { %653 = vsyncadd (%p553_p8), %s454_s29, 4294967040  ;;  %p12_p9 = scmp.ge.s32.totalorder %s719_s15, 4   ;;  %s836_s9 = smov %s660_s10 }
 0x12f   : > { %s837_s10 = smov %s664_s11  ;;  %s838_s11 = smov %s730_s18 }
 0x130   : > { %s839_s12 = smov %s719_s15  ;;  %14 = sbr.rel (!%p12_p9) target bundleno = 3 (0x3), region = 66 }
 0x135   :  { %460 = vsyncpa [#allocation3], 1 }
 0x136   :  { %462 = vsyncpa [#allocation3 + $0x1], 1 }

</bundles_post_ra>
